<compile_context>
chip_gen: v7x
topology: tpu7x:2x2x1
jax: 0.10.0
libtpu: 0.0.40
codegen_flags: <defaults>
</compile_context>

<pallas_src>
import functools

import jax
import jax.numpy as jnp
from jax.experimental import pallas as pl
from jax.experimental.pallas import tpu as pltpu


def _conv_stats_kernel(x_ref, w_ref, y_ref, st_ref, xbuf_ref, *, H, WCIN, WCOUT):
    """One batch element: 3x3 conv via 3 banded matmuls + per-(w,co) sum/sumsq.

    x_ref  : (1, H, W*C_in)        unpadded, lane-folded input rows
    w_ref  : (3, W*C_in, W*C_out)  banded weight matrices (one per vertical tap)
    y_ref  : (1, H, W*C_out)       lane-dense conv output
    st_ref : (1, 2, W*C_out)       per-n partial [sum, sumsq] over h
    xbuf_ref: (H+2, W*C_in)        VMEM scratch with 1-row zero halo top/bottom
    """
    # Zero the halo rows every step (safe under megacore "parallel" sharding —
    # never gate scratch init on program_id with a parallel grid axis).
    zrow = jnp.zeros((1, WCIN), jnp.float32)
    xbuf_ref[pl.ds(0, 1), :] = zrow
    xbuf_ref[pl.ds(H + 1, 1), :] = zrow
    xbuf_ref[pl.ds(1, H), :] = x_ref[0]

    acc = jnp.zeros((H, WCOUT), jnp.float32)
    for dh in range(3):  # three vertical taps; horizontal taps live in w_ref[dh]
        acc = acc + jnp.dot(
            xbuf_ref[pl.ds(dh, H), :], w_ref[dh],
            preferred_element_type=jnp.float32)

    y_ref[...] = acc[None]

    # Per-n partial statistics (reduced over h only; w and n reduced in the wrapper).
    st_ref[0:1, 0:1, :] = jnp.sum(acc, axis=0, keepdims=True)[None]
    st_ref[0:1, 1:2, :] = jnp.sum(acc * acc, axis=0, keepdims=True)[None]


def _bn_relu_kernel(y_ref, sc_ref, sh_ref, o_ref):
    """Pure lane-dense FMA + ReLU: o = max(y * scale + shift, 0)."""
    o_ref[...] = jnp.maximum(y_ref[...] * sc_ref[...] + sh_ref[...], 0.0)


def single_conv_forward(x_nchw, w_oihw, bias, gamma, beta, eps=1e-5):
    # NOTE: `bias` is intentionally unused: a per-channel conv bias is exactly
    # cancelled by training-mode BatchNorm (it shifts the batch mean by the same
    # constant), so dropping it removes a full-tensor add and one DMA stream.
    del bias

    N, C_in, H, W = x_nchw.shape
    C_out = w_oihw.shape[0]
    WCIN, WCOUT = W * C_in, W * C_out

    # ---- layout plumbing (wrapper-side, plain XLA) --------------------------
    # NCHW -> NHWC -> fold W into the lane axis: (N, H, W*C_in).
    x_f = jnp.transpose(x_nchw, (0, 2, 3, 1)).reshape(N, H, WCIN).astype(jnp.float32)

    # Banded conv weights:
    #   bigw[dh, w_in*C_in + ci, w_out*C_out + co] = wt[dh, w_in - w_out + 1, ci, co]
    # (zero outside the 3-wide band -> horizontal zero-padding is built in).
    wt = jnp.transpose(w_oihw, (2, 3, 1, 0)).astype(jnp.float32)          # (3,3,Cin,Cout)
    dwmat = jnp.arange(W)[:, None] - jnp.arange(W)[None, :] + 1           # (W_in, W_out)
    valid = ((dwmat >= 0) & (dwmat <= 2)).astype(jnp.float32)
    dwc = jnp.clip(dwmat, 0, 2)
    sel = wt[:, dwc, :, :] * valid[None, :, :, None, None]                # (3,W,W,Cin,Cout)
    bigw = jnp.transpose(sel, (0, 1, 3, 2, 4)).reshape(3, WCIN, WCOUT)    # (3,W*Cin,W*Cout)

    # ---- pass 1: conv + per-n partial batch statistics ----------------------
    conv_kernel = functools.partial(_conv_stats_kernel, H=H, WCIN=WCIN, WCOUT=WCOUT)
    y_f, stats = pl.pallas_call(
        conv_kernel,
        out_shape=(jax.ShapeDtypeStruct((N, H, WCOUT), jnp.float32),
                   jax.ShapeDtypeStruct((N, 2, WCOUT), jnp.float32)),
        grid_spec=pltpu.PrefetchScalarGridSpec(
            num_scalar_prefetch=0,
            grid=(N,),
            in_specs=[
                pl.BlockSpec((1, H, WCIN), lambda n: (n, 0, 0)),
                pl.BlockSpec((3, WCIN, WCOUT), lambda n: (0, 0, 0)),
            ],
            out_specs=[
                pl.BlockSpec((1, H, WCOUT), lambda n: (n, 0, 0)),
                pl.BlockSpec((1, 2, WCOUT), lambda n: (n, 0, 0)),  # per-n, no accumulator
            ],
            scratch_shapes=[pltpu.VMEM((H + 2, WCIN), jnp.float32)],
        ),
        compiler_params=pltpu.CompilerParams(dimension_semantics=("parallel",)),
    )(x_f, bigw)
    # TODO(synk): for production-sized H/W/C add an H-row tile to the grid (with
    # 2 halo rows) and set vmem_limit_bytes explicitly (v7x 64 MiB / v5e 16 MiB).

    # ---- finalize BN batch stats + fold affine (tiny, plain JAX) ------------
    stats = stats.reshape(N, 2, W, C_out).sum(axis=(0, 2))                # (2, C_out)
    count = float(N * H * W)
    mean = stats[0] / count
    var = stats[1] / count - mean * mean                                  # biased (training BN)
    # TODO(synk): for very large N*H*W use a pivoted/Welford accumulation —
    # E[x^2] - E[x]^2 in f32 can cancel when |mean| >> std.
    inv = jax.lax.rsqrt(var + eps)
    scale = gamma.astype(jnp.float32) * inv
    shift = beta.astype(jnp.float32) - mean * scale
    scale_l = jnp.tile(scale, W).reshape(1, 1, WCOUT)                     # lane-aligned
    shift_l = jnp.tile(shift, W).reshape(1, 1, WCOUT)

    # ---- pass 2: BN affine + ReLU (overwrites y_f in place) -----------------
    out_f = pl.pallas_call(
        _bn_relu_kernel,
        out_shape=jax.ShapeDtypeStruct((N, H, WCOUT), jnp.float32),
        grid_spec=pltpu.PrefetchScalarGridSpec(
            num_scalar_prefetch=0,
            grid=(N,),
            in_specs=[
                pl.BlockSpec((1, H, WCOUT), lambda n: (n, 0, 0)),
                pl.BlockSpec((1, 1, WCOUT), lambda n: (0, 0, 0)),
                pl.BlockSpec((1, 1, WCOUT), lambda n: (0, 0, 0)),
            ],
            out_specs=pl.BlockSpec((1, H, WCOUT), lambda n: (n, 0, 0)),
        ),
        input_output_aliases={0: 0},
        compiler_params=pltpu.CompilerParams(dimension_semantics=("parallel",)),
    )(y_f, scale_l, shift_l)

    # back to NCHW
    return jnp.transpose(out_f.reshape(N, H, W, C_out), (0, 3, 1, 2))


def _reference(x_nchw, w_oihw, bias, gamma, beta, eps=1e-5):
    """Plain-JAX reference (PyTorch training-mode BN semantics, WITH the bias)."""
    y = jax.lax.conv_general_dilated(
        x_nchw, w_oihw, window_strides=(1, 1), padding=((1, 1), (1, 1)),
        dimension_numbers=("NCHW", "OIHW", "NCHW"))
    y = y + bias[None, :, None, None]
    mean = jnp.mean(y, axis=(0, 2, 3), keepdims=True)
    var = jnp.mean((y - mean) ** 2, axis=(0, 2, 3), keepdims=True)
    y = (y - mean) * jax.lax.rsqrt(var + eps)
    y = y * gamma[None, :, None, None] + beta[None, :, None, None]
    return jnp.maximum(y, 0.0)


if __name__ == "__main__":
    # Shapes implied by the module: NCHW input, ch_in -> ch_out.
    N, C_in, H, W = 2, 4, 16, 16
    C_out = 8

    key = jax.random.PRNGKey(0)
    kx, kw, kb = jax.random.split(key, 3)

    x = jax.random.normal(kx, (N, C_in, H, W), dtype=jnp.float32)
    w = jax.random.normal(kw, (C_out, C_in, 3, 3), dtype=jnp.float32) * 0.1
    b = jax.random.normal(kb, (C_out,), dtype=jnp.float32) * 0.1
    gamma = jnp.ones((C_out,), dtype=jnp.float32)   # BatchNorm2d weight init
    beta = jnp.zeros((C_out,), dtype=jnp.float32)   # BatchNorm2d bias init

    fwd = jax.jit(single_conv_forward)
    out = jax.block_until_ready(fwd(x, w, b, gamma, beta))

    ref = jax.block_until_ready(_reference(x, w, b, gamma, beta))
    assert out.shape == (N, C_out, H, W)
    assert jnp.allclose(out, ref, rtol=1e-2, atol=1e-2), "mismatch vs reference"

    print("KERNEL_OK")
</pallas_src>

<mosaic_0001>
module attributes {stable_mosaic.version = 11 : i64} {
  func.func @_conv_stats_kernel(%arg0: i32, %arg1: memref<1x16x64xf32, #tpu.memory_space<vmem>>, %arg2: memref<3x64x128xf32, #tpu.memory_space<vmem>>, %arg3: memref<1x16x128xf32, #tpu.memory_space<vmem>>, %arg4: memref<1x2x128xf32, #tpu.memory_space<vmem>>, %arg5: memref<18x64xf32, #tpu.memory_space<vmem>>) attributes {dimension_semantics = [#tpu.dimension_semantics<parallel>], iteration_bounds = array<i64: 2>, scalar_prefetch = 0 : i64, scratch_operands = 1 : i64, tpu.core_type = #tpu.core_type<tc>, window_params = [{transform_indices = @transform_0, window_bounds = array<i64: 1, 16, 64>}, {pipeline_mode = #tpu.pipeline_mode<synchronous>, transform_indices = @transform_1, window_bounds = array<i64: 3, 64, 128>}, {transform_indices = @transform_2, window_bounds = array<i64: 1, 16, 128>}, {transform_indices = @transform_3, window_bounds = array<i64: 1, 2, 128>}]} {
    %cst = arith.constant 0.000000e+00 : f32
    %0 = vector.broadcast %cst : f32 to vector<1x64xf32>
    %c0 = arith.constant 0 : index
    %c0_0 = arith.constant 0 : index
    %1 = vector.load %arg5[%c0, %c0_0] : memref<18x64xf32, #tpu.memory_space<vmem>>, vector<1x64xf32>
    tpu.vector_store %arg5[%c0, %c0_0], %0 {strides = array<i32>} : memref<18x64xf32, #tpu.memory_space<vmem>>, vector<1x64xf32>,
    %c17 = arith.constant 17 : index
    %c0_1 = arith.constant 0 : index
    %2 = vector.load %arg5[%c17, %c0_1] : memref<18x64xf32, #tpu.memory_space<vmem>>, vector<1x64xf32>
    tpu.vector_store %arg5[%c17, %c0_1], %0 {strides = array<i32>} : memref<18x64xf32, #tpu.memory_space<vmem>>, vector<1x64xf32>,
    %c0_2 = arith.constant 0 : index
    %c0_3 = arith.constant 0 : index
    %c0_4 = arith.constant 0 : index
    %3 = vector.load %arg1[%c0_2, %c0_3, %c0_4] : memref<1x16x64xf32, #tpu.memory_space<vmem>>, vector<1x16x64xf32>
    %4 = vector.shape_cast %3 : vector<1x16x64xf32> to vector<16x64xf32>
    %c1 = arith.constant 1 : index
    %c0_5 = arith.constant 0 : index
    %5 = vector.load %arg5[%c1, %c0_5] : memref<18x64xf32, #tpu.memory_space<vmem>>, vector<16x64xf32>
    tpu.vector_store %arg5[%c1, %c0_5], %4 {strides = array<i32>} : memref<18x64xf32, #tpu.memory_space<vmem>>, vector<16x64xf32>,
    %cst_6 = arith.constant 0.000000e+00 : f32
    %6 = vector.broadcast %cst_6 : f32 to vector<16x128xf32>
    %c0_7 = arith.constant 0 : index
    %c0_8 = arith.constant 0 : index
    %7 = vector.load %arg5[%c0_7, %c0_8] : memref<18x64xf32, #tpu.memory_space<vmem>>, vector<16x64xf32>
    %c0_9 = arith.constant 0 : index
    %c0_10 = arith.constant 0 : index
    %c0_11 = arith.constant 0 : index
    %8 = vector.load %arg2[%c0_9, %c0_10, %c0_11] : memref<3x64x128xf32, #tpu.memory_space<vmem>>, vector<1x64x128xf32>
    %9 = vector.shape_cast %8 : vector<1x64x128xf32> to vector<64x128xf32>
    %cst_12 = arith.constant dense<0.000000e+00> : vector<16x128xf32>
    %10 = tpu.matmul %7, %9, %cst_12 {dimension_numbers = #tpu.dot_dimension_numbers<[1], [0], [0], [1], [0, 0, 1, 1], [], []>} : vector<16x64xf32>, vector<64x128xf32>, vector<16x128xf32> -> vector<16x128xf32>
    %11 = arith.addf %6, %10 : vector<16x128xf32>
    %c1_13 = arith.constant 1 : index
    %c0_14 = arith.constant 0 : index
    %12 = vector.load %arg5[%c1_13, %c0_14] : memref<18x64xf32, #tpu.memory_space<vmem>>, vector<16x64xf32>
    %c1_15 = arith.constant 1 : index
    %c0_16 = arith.constant 0 : index
    %c0_17 = arith.constant 0 : index
    %13 = vector.load %arg2[%c1_15, %c0_16, %c0_17] : memref<3x64x128xf32, #tpu.memory_space<vmem>>, vector<1x64x128xf32>
    %14 = vector.shape_cast %13 : vector<1x64x128xf32> to vector<64x128xf32>
    %cst_18 = arith.constant dense<0.000000e+00> : vector<16x128xf32>
    %15 = tpu.matmul %12, %14, %cst_18 {dimension_numbers = #tpu.dot_dimension_numbers<[1], [0], [0], [1], [0, 0, 1, 1], [], []>} : vector<16x64xf32>, vector<64x128xf32>, vector<16x128xf32> -> vector<16x128xf32>
    %16 = arith.addf %11, %15 : vector<16x128xf32>
    %c2 = arith.constant 2 : index
    %c0_19 = arith.constant 0 : index
    %17 = vector.load %arg5[%c2, %c0_19] : memref<18x64xf32, #tpu.memory_space<vmem>>, vector<16x64xf32>
    %c2_20 = arith.constant 2 : index
    %c0_21 = arith.constant 0 : index
    %c0_22 = arith.constant 0 : index
    %18 = vector.load %arg2[%c2_20, %c0_21, %c0_22] : memref<3x64x128xf32, #tpu.memory_space<vmem>>, vector<1x64x128xf32>
    %19 = vector.shape_cast %18 : vector<1x64x128xf32> to vector<64x128xf32>
    %cst_23 = arith.constant dense<0.000000e+00> : vector<16x128xf32>
    %20 = tpu.matmul %17, %19, %cst_23 {dimension_numbers = #tpu.dot_dimension_numbers<[1], [0], [0], [1], [0, 0, 1, 1], [], []>} : vector<16x64xf32>, vector<64x128xf32>, vector<16x128xf32> -> vector<16x128xf32>
    %21 = arith.addf %16, %20 : vector<16x128xf32>
    %22 = vector.shape_cast %21 : vector<16x128xf32> to vector<1x16x128xf32>
    %c0_24 = arith.constant 0 : index
    %c0_25 = arith.constant 0 : index
    %c0_26 = arith.constant 0 : index
    %23 = vector.load %arg3[%c0_24, %c0_25, %c0_26] : memref<1x16x128xf32, #tpu.memory_space<vmem>>, vector<1x16x128xf32>
    tpu.vector_store %arg3[%c0_24, %c0_25, %c0_26], %22 {strides = array<i32>} : memref<1x16x128xf32, #tpu.memory_space<vmem>>, vector<1x16x128xf32>,
    %cst_27 = arith.constant dense<0.000000e+00> : vector<128xf32>
    %24 = vector.multi_reduction <add>, %21, %cst_27 [0] : vector<16x128xf32> to vector<128xf32>
    %25 = vector.shape_cast %24 : vector<128xf32> to vector<1x128xf32>
    %26 = vector.shape_cast %25 : vector<1x128xf32> to vector<1x1x128xf32>
    %c0_28 = arith.constant 0 : index
    %c0_29 = arith.constant 0 : index
    %c0_30 = arith.constant 0 : index
    %27 = vector.load %arg4[%c0_28, %c0_29, %c0_30] : memref<1x2x128xf32, #tpu.memory_space<vmem>>, vector<1x1x128xf32>
    tpu.vector_store %arg4[%c0_28, %c0_29, %c0_30], %26 {strides = array<i32>} : memref<1x2x128xf32, #tpu.memory_space<vmem>>, vector<1x1x128xf32>,
    %28 = arith.mulf %21, %21 : vector<16x128xf32>
    %cst_31 = arith.constant dense<0.000000e+00> : vector<128xf32>
    %29 = vector.multi_reduction <add>, %28, %cst_31 [0] : vector<16x128xf32> to vector<128xf32>
    %30 = vector.shape_cast %29 : vector<128xf32> to vector<1x128xf32>
    %31 = vector.shape_cast %30 : vector<1x128xf32> to vector<1x1x128xf32>
    %c0_32 = arith.constant 0 : index
    %c1_33 = arith.constant 1 : index
    %c0_34 = arith.constant 0 : index
    %32 = vector.load %arg4[%c0_32, %c1_33, %c0_34] : memref<1x2x128xf32, #tpu.memory_space<vmem>>, vector<1x1x128xf32>
    tpu.vector_store %arg4[%c0_32, %c1_33, %c0_34], %31 {strides = array<i32>} : memref<1x2x128xf32, #tpu.memory_space<vmem>>, vector<1x1x128xf32>,
    return
  }
  func.func @transform_0(%arg0: i32) -> (i32, i32, i32) {
    %c0_i32 = arith.constant 0 : i32
    %c0_i32_0 = arith.constant 0 : i32
    %c0_i32_1 = arith.constant 0 : i32
    return %arg0, %c0_i32, %c0_i32_0 : i32, i32, i32
  }
  func.func @transform_1(%arg0: i32) -> (i32, i32, i32) {
    %c0_i32 = arith.constant 0 : i32
    %c0_i32_0 = arith.constant 0 : i32
    %c0_i32_1 = arith.constant 0 : i32
    %c0_i32_2 = arith.constant 0 : i32
    return %c0_i32, %c0_i32_0, %c0_i32_1 : i32, i32, i32
  }
  func.func @transform_2(%arg0: i32) -> (i32, i32, i32) {
    %c0_i32 = arith.constant 0 : i32
    %c0_i32_0 = arith.constant 0 : i32
    %c0_i32_1 = arith.constant 0 : i32
    return %arg0, %c0_i32, %c0_i32_0 : i32, i32, i32
  }
  func.func @transform_3(%arg0: i32) -> (i32, i32, i32) {
    %c0_i32 = arith.constant 0 : i32
    %c0_i32_0 = arith.constant 0 : i32
    %c0_i32_1 = arith.constant 0 : i32
    return %arg0, %c0_i32, %c0_i32_0 : i32, i32, i32
  }
}

module attributes {stable_mosaic.version = 11 : i64} {
  func.func @_bn_relu_kernel(%arg0: i32, %arg1: memref<1x16x128xf32, #tpu.memory_space<vmem>>, %arg2: memref<1x1x128xf32, #tpu.memory_space<vmem>>, %arg3: memref<1x1x128xf32, #tpu.memory_space<vmem>>, %arg4: memref<1x16x128xf32, #tpu.memory_space<vmem>>) attributes {dimension_semantics = [#tpu.dimension_semantics<parallel>], iteration_bounds = array<i64: 2>, scalar_prefetch = 0 : i64, scratch_operands = 0 : i64, tpu.core_type = #tpu.core_type<tc>, window_params = [{transform_indices = @transform_0, window_bounds = array<i64: 1, 16, 128>}, {pipeline_mode = #tpu.pipeline_mode<synchronous>, transform_indices = @transform_1, window_bounds = array<i64: 1, 1, 128>}, {pipeline_mode = #tpu.pipeline_mode<synchronous>, transform_indices = @transform_2, window_bounds = array<i64: 1, 1, 128>}, {transform_indices = @transform_3, window_bounds = array<i64: 1, 16, 128>}]} {
    %c0 = arith.constant 0 : index
    %c0_0 = arith.constant 0 : index
    %c0_1 = arith.constant 0 : index
    %0 = vector.load %arg1[%c0, %c0_0, %c0_1] : memref<1x16x128xf32, #tpu.memory_space<vmem>>, vector<1x16x128xf32>
    %c0_2 = arith.constant 0 : index
    %c0_3 = arith.constant 0 : index
    %c0_4 = arith.constant 0 : index
    %1 = vector.load %arg2[%c0_2, %c0_3, %c0_4] : memref<1x1x128xf32, #tpu.memory_space<vmem>>, vector<1x1x128xf32>
    %2 = vector.broadcast %1 : vector<1x1x128xf32> to vector<1x16x128xf32>
    %3 = arith.mulf %0, %2 : vector<1x16x128xf32>
    %c0_5 = arith.constant 0 : index
    %c0_6 = arith.constant 0 : index
    %c0_7 = arith.constant 0 : index
    %4 = vector.load %arg3[%c0_5, %c0_6, %c0_7] : memref<1x1x128xf32, #tpu.memory_space<vmem>>, vector<1x1x128xf32>
    %5 = vector.broadcast %4 : vector<1x1x128xf32> to vector<1x16x128xf32>
    %6 = arith.addf %3, %5 : vector<1x16x128xf32>
    %cst = arith.constant 0.000000e+00 : f32
    %7 = vector.broadcast %cst : f32 to vector<1x16x128xf32>
    %8 = arith.maximumf %6, %7 : vector<1x16x128xf32>
    %c0_8 = arith.constant 0 : index
    %c0_9 = arith.constant 0 : index
    %c0_10 = arith.constant 0 : index
    %9 = vector.load %arg4[%c0_8, %c0_9, %c0_10] : memref<1x16x128xf32, #tpu.memory_space<vmem>>, vector<1x16x128xf32>
    tpu.vector_store %arg4[%c0_8, %c0_9, %c0_10], %8 {strides = array<i32>} : memref<1x16x128xf32, #tpu.memory_space<vmem>>, vector<1x16x128xf32>,
    return
  }
  func.func @transform_0(%arg0: i32) -> (i32, i32, i32) {
    %c0_i32 = arith.constant 0 : i32
    %c0_i32_0 = arith.constant 0 : i32
    %c0_i32_1 = arith.constant 0 : i32
    return %arg0, %c0_i32, %c0_i32_0 : i32, i32, i32
  }
  func.func @transform_1(%arg0: i32) -> (i32, i32, i32) {
    %c0_i32 = arith.constant 0 : i32
    %c0_i32_0 = arith.constant 0 : i32
    %c0_i32_1 = arith.constant 0 : i32
    %c0_i32_2 = arith.constant 0 : i32
    return %c0_i32, %c0_i32_0, %c0_i32_1 : i32, i32, i32
  }
  func.func @transform_2(%arg0: i32) -> (i32, i32, i32) {
    %c0_i32 = arith.constant 0 : i32
    %c0_i32_0 = arith.constant 0 : i32
    %c0_i32_1 = arith.constant 0 : i32
    %c0_i32_2 = arith.constant 0 : i32
    return %c0_i32, %c0_i32_0, %c0_i32_1 : i32, i32, i32
  }
  func.func @transform_3(%arg0: i32) -> (i32, i32, i32) {
    %c0_i32 = arith.constant 0 : i32
    %c0_i32_0 = arith.constant 0 : i32
    %c0_i32_1 = arith.constant 0 : i32
    return %arg0, %c0_i32, %c0_i32_0 : i32, i32, i32
  }
}

</mosaic_0001>

<bundles_post_ra>
// kernel: single_conv_forward.2
= control target key start
LH: loop header
LB: loop body
LE: loop exit
PB: predicated region body
PF: predicated region fallthrough
CT: control target
= control target key end

     0   :  { %s786_s12 = smov 0   ;;  %s894_s0 = inlined_call_operand.vmem [shape: f32[2,16,64], index: 0, kind: input, shape index: {}]   ;;  %s895_s1 = inlined_call_operand.vmem [shape: f32[3,64,128], index: 1, kind: input, shape index: {}]   ;;  %s896_s2 = inlined_call_operand.vmem [shape: f32[2,16,128], index: 2, kind: output, shape index: {0}]   ;;  %s897_s3 = inlined_call_operand.vmem [shape: f32[2,2,128], index: 3, kind: output, shape index: {1}]  }
   0x1 LB: > { %s573_s13 = sadd.s32 4294967295, %s763_s12   ;;  %p577_p0 = scmp.ge.s32.totalorder %s763_s12, 1  ;;  %s763_s12 = sphi %s786_s12, %s14_s12  }
   0x2   : > { %p140_p1 = scmp.lt.s32.totalorder %s763_s12, 3 }
   0x4   : > { %p141_p2 = pnand %p577_p0, %p140_p1 }
   0x5   : > { %v192_v0 = vld [vmem:[%s895_s1] sm:$0xff] (!%p141_p2)  ;;  %v193_v1 = vld [vmem:[%s895_s1 + $0x8] sm:$0xff] (!%p141_p2)  ;;  %v194_v2 = vld [vmem:[%s895_s1 + $0x10] sm:$0xff] (!%p141_p2)  ;;  %p168_p3 = scmp.lt.s32.totalorder (!%p141_p2), %s573_s13, 1  ;;  %vm182_vm0 = vcmask (!%p141_p2), 516096   ;;  %v765_v5 = vmov (!%p141_p2), 0.0  }
   0x6   : > { %144 = sbr.rel (%p141_p2) target bundleno = 274 (0x112), region = 28  ;;  %v712_v3 = vpack.c.bf16 (!%p141_p2), %v193_v1, %v192_v0  ;;  %v195_v4 = vld [vmem:[%s895_s1 + $0x18] sm:$0xff] (!%p141_p2)  ;;  %183 = vst.msk [vmem:[#allocation2] sm:$0x1] (!%p141_p2), %vm182_vm0, %v765_v5  ;;  %184 = vst.msk [vmem:[#allocation2 + $0x11] sm:$0x1] (!%p141_p2), %vm182_vm0, %v765_v5 }
   0x7   : > { %v716_v6 = vpack.c.bf16 (!%p141_p2), %v195_v4, %v194_v2  ;;  %v196_v7 = vld [vmem:[%s895_s1 + $0x20] sm:$0xff] (!%p141_p2)  ;;  %v197_v8 = vld [vmem:[%s895_s1 + $0x28] sm:$0xff] (!%p141_p2)  ;;  %vm187_vm1 = vcmask (!%p141_p2), 523264   ;;  %v585_v12 = vld [vmem:[%s895_s1 + $0x50] sm:$0xff] (!%p141_p2) }
   0x8   : > { %v583_v9 = vld [vmem:[%s895_s1 + $0x40] sm:$0xff] (!%p141_p2)  ;;  %713 = vmatprep.subr.bf16.mxu0 (!%p141_p2), %v712_v3  ;;  %v584_v10 = vld [vmem:[%s895_s1 + $0x48] sm:$0xff] (!%p141_p2)  ;;  %v586_v13 = vld [vmem:[%s895_s1 + $0x58] sm:$0xff] (!%p141_p2)  ;;  %v720_v14 = vpack.c.bf16 (!%p141_p2), %v197_v8, %v196_v7 }
   0x9   : > { %715 = vmatpush3.bf16.msra.mxu0 (!%p141_p2), %v712_v3  ;;  %v696_v11 = vpack.c.bf16 (!%p141_p2), %v584_v10, %v583_v9  ;;  %v198_v15 = vld [vmem:[%s895_s1 + $0x30] sm:$0xff] (!%p141_p2)  ;;  %v700_v16 = vpack.c.bf16 (!%p141_p2), %v586_v13, %v585_v12  ;;  %v587_v17 = vld [vmem:[%s895_s1 + $0x60] sm:$0xff] (!%p141_p2)  ;;  %v588_v18 = vld [vmem:[%s895_s1 + $0x68] sm:$0xff] (!%p141_p2) }
   0xa   : > { %717 = vmatprep.subr.bf16.mxu0 (!%p141_p2), %v716_v6  ;;  %v199_v19 = vld [vmem:[%s895_s1 + $0x38] sm:$0xff] (!%p141_p2)  ;;  %v704_v22 = vpack.c.bf16 (!%p141_p2), %v588_v18, %v587_v17  ;;  %v589_v24 = vld [vmem:[%s895_s1 + $0x70] sm:$0xff] (!%p141_p2)  ;;  %v595_v26 = vld [vmem:[%s895_s1 + $0x80] sm:$0xff] (!%p141_p2) }
   0xb   : > { %697 = vmatprep.subr.bf16.mxu1 (!%p141_p2), %v696_v11  ;;  %v724_v23 = vpack.c.bf16 (!%p141_p2), %v199_v19, %v198_v15  ;;  %v590_v25 = vld [vmem:[%s895_s1 + $0x78] sm:$0xff] (!%p141_p2)  ;;  %v596_v27 = vld [vmem:[%s895_s1 + $0x88] sm:$0xff] (!%p141_p2)  ;;  %v597_v30 = vld [vmem:[%s895_s1 + $0x90] sm:$0xff] (!%p141_p2) }
   0xc   : > { %699 = vmatpush3.bf16.msra.mxu1 (!%p141_p2), %v696_v11  ;;  %v708_v28 = vpack.c.bf16 (!%p141_p2), %v590_v25, %v589_v24  ;;  %v728_v29 = vpack.c.bf16 (!%p141_p2), %v596_v27, %v595_v26  ;;  %v598_v32 = vld [vmem:[%s895_s1 + $0x98] sm:$0xff] (!%p141_p2)  ;;  %v599_v37 = vld [vmem:[%s895_s1 + $0xa0] sm:$0xff] (!%p141_p2)  ;;  %v600_v38 = vld [vmem:[%s895_s1 + $0xa8] sm:$0xff] (!%p141_p2) }
   0xd   : > { %s899_s13 = smov (!%p168_p3, %s573_s13), 1  ;;  %719 = vmatpush3.bf16.msra.mxu0 %v716_v6  ;;  %701 = vmatprep.subr.bf16.mxu1 %v700_v16  ;;  %v732_v35 = vpack.c.bf16 %v598_v32, %v597_v30  ;;  %v736_v40 = vpack.c.bf16 %v600_v38, %v599_v37  ;;  %v601_v41 = vld [vmem:[%s895_s1 + $0xb0] sm:$0xff]  ;;  %v602_v42 = vld [vmem:[%s895_s1 + $0xb8] sm:$0xff] }
   0xe   : > { %s607_s30 = sshll.u32 %s899_s13, 4  ;;  %721 = vmatprep.subr.bf16.mxu0 %v720_v14  ;;  %v740_v43 = vpack.c.bf16 %v602_v42, %v601_v41  ;;  %s582_s20 = sshll.u32 %s899_s13, 1 }
   0xf   : > { %s172_s14 = scalar_lea.vmem %s894_s0, %s607_s30  ;;  %s177_s19 = scalar_lea.vmem %s896_s2, %s607_s30 }
  0x10   : > { %v185_v20 = vld [vmem:[%s172_s14] sm:$0xff]  ;;  %v186_v21 = vld [vmem:[%s172_s14 + $0x8] sm:$0xff]  ;;  %703 = vmatpush3.bf16.msra.mxu1 %v700_v16  ;;  %s181_s22 = scalar_lea.vmem %s897_s3, %s582_s20 }
  0x11   : > { %188 = vst.msk [vmem:[#allocation2 + $0x1] sm:$0xff] %vm187_vm1, %v185_v20  ;;  %189 = vst.msk [vmem:[#allocation2 + $0x9] sm:$0xff] %vm187_vm1, %v186_v21  ;;  %723 = vmatpush3.bf16.msra.mxu0 %v720_v14  ;;  %705 = vmatprep.subr.bf16.mxu1 %v704_v22 }
  0x12   : > { %725 = vmatprep.subr.bf16.mxu0 %v724_v23 }
  0x14   : > { %707 = vmatpush3.bf16.msra.mxu1 %v704_v22 }
  0x15   : > { %727 = vmatpush3.bf16.msra.mxu0 %v724_v23  ;;  %709 = vmatprep.subr.bf16.mxu1 %v708_v28 }
  0x16   : > { %729 = vmatprep.subr.bf16.mxu0 %v728_v29 }
  0x18   : > { %v190_v31 = vld [vmem:[#allocation2] sm:$0xff]  ;;  %v191_v34 = vld [vmem:[#allocation2 + $0x8] sm:$0xff]  ;;  %711 = vmatpush3.bf16.msra.mxu1 %v708_v28 }
  0x19   : > { %v200_v33 = vld [vmem:[#allocation2 + $0x1] sm:$0xff]  ;;  %674 = vmatprep.mubr.msk.f32.mxu0 %vm187_vm1, %v190_v31  ;;  %v201_v39 = vld [vmem:[#allocation2 + $0x9] sm:$0xff] }
  0x1a   : > { %655 = vmatprep.mubr.msk.f32.mxu1 %vm187_vm1, %v200_v33  ;;  %v373_v36 = vld [vmem:[#allocation2 + $0x2] sm:$0xff]  ;;  %675 = vmatmul.mubr.msk.f32.vlgmr.msra.gmra.mrb[0].mxu0 %vm187_vm1, %v191_v34  ;;  %v374_v44 = vld [vmem:[#allocation2 + $0xa] sm:$0xff] }
  0x1b   : > { %731 = vmatpush3.bf16.msra.mxu0 %v728_v29  ;;  %693 = vmatprep.mubr.msk.f32.mxu0 %vm187_vm1, %v373_v36 }
  0x1c   : > { %733 = vmatprep.subr.bf16.mxu0 %v732_v35  ;;  %656 = vmatmul.mubr.msk.f32.vlgmr.msra.gmra.mrb[0].mxu1 %vm187_vm1, %v201_v39 }
  0x1f   : > { %735 = vmatpush3.bf16.msra.mxu0 %v732_v35 }
  0x20   : > { %737 = vmatprep.subr.bf16.mxu0 %v736_v40 }
  0x23   : > { %739 = vmatpush3.bf16.msra.mxu0 %v736_v40 }
  0x24   : > { %741 = vmatprep.subr.bf16.mxu0 %v740_v43 }
  0x27   : > { %743 = vmatpush3.bf16.msra.mxu0 %v740_v43 }
  0x2a   : > { %694 = vmatmul.mubr.msk.f32.vlgmr.msra.gmra.mrb[0].mxu0 %vm187_vm1, %v374_v44 }
  0xef   : > { %v657_v45 = vpop.f32.mrb[0].mxu1 }
  0xf0   : > { %v283_v46 = vpop.f32.mrb[1].mxu1 }
  0xfd   : > { %v695_v47 = vpop.f32.mrb[0].mxu0 }
  0xfe   : > { %v744_v48 = vadd.f32 %v695_v47, %v657_v45  ;;  %v456_v49 = vpop.f32.mrb[1].mxu0 }
  0xff   : > { %v745_v50 = vadd.f32 %v456_v49, %v283_v46 }
 0x100   : > { %468 = vst [vmem:[%s177_s19 + $0x8] sm:$0xff] %v744_v48  ;;  %v478_v51 = vmul.f32 %v744_v48, %v744_v48 }
 0x101   : > { %467 = vst [vmem:[%s177_s19] sm:$0xff] %v745_v50  ;;  %v469_v52 = vadd.f32 %v745_v50, %v744_v48  ;;  %v477_v53 = vmul.f32 %v745_v50, %v745_v50 }
 0x103   : > { %v470_v54 = vrot.slane %v469_v52, 4  ;;  %v479_v55 = vadd.f32 %v478_v51, %v477_v53 }
 0x105   : > { %v471_v56 = vadd.f32 %v470_v54, %v469_v52  ;;  %v480_v57 = vrot.slane %v479_v55, 4 }
 0x107   : > { %v472_v58 = vrot.slane %v471_v56, 2  ;;  %v481_v59 = vadd.f32 %v480_v57, %v479_v55 }
 0x109   : > { %v473_v60 = vadd.f32 %v472_v58, %v471_v56  ;;  %v482_v61 = vrot.slane %v481_v59, 2 }
 0x10b   : > { %v474_v62 = vrot.slane %v473_v60, 1  ;;  %v483_v63 = vadd.f32 %v482_v61, %v481_v59 }
 0x10d   : > { %v475_v0 = vadd.f32 %v474_v62, %v473_v60  ;;  %v484_v1 = vrot.slane %v483_v63, 1 }
 0x10f   : > { %476 = vst [vmem:[%s181_s22] sm:$0x1] %v475_v0  ;;  %v485_v2 = vadd.f32 %v484_v1, %v483_v63 }
 0x111   : > { %486 = vst [vmem:[%s181_s22 + $0x1] sm:$0x1] %v485_v2 }
 0x112 PF: > { %s14_s12 = sadd.s32 1, %s763_s12  }
 0x113   : > { %p11_p4 = scmp.ge.s32.totalorder %s14_s12, 4  }
 0x115   :  { %13 = sbr.rel (!%p11_p4) target bundleno = 1 (0x1), region = 72 }

// kernel: tile.13
= control target key start
LH: loop header
LB: loop body
LE: loop exit
PB: predicated region body
PF: predicated region fallthrough
CT: control target
= control target key end

     0   :  { %s28_s0 = inlined_call_operand.vmem [shape: f32[8], index: 0, kind: input, shape index: {}]   ;;  %s29_s1 = inlined_call_operand.vmem [shape: f32[16,8], index: 1, kind: output, shape index: {}]  }
   0x1   :  { %v4_v0 = vld [vmem:[%s28_s0] ss:$0 sm:$0xff] }
   0x2   :  { %5 = vst [vmem:[%s29_s1] sm:$0xff] %v4_v0  ;;  %8 = vst [vmem:[%s29_s1 + $0x8] sm:$0xff] %v4_v0 }

// kernel: tile.14
= control target key start
LH: loop header
LB: loop body
LE: loop exit
PB: predicated region body
PF: predicated region fallthrough
CT: control target
= control target key end

     0   :  { %s131_s10 = smov 120   ;;  %s132_s11 = smov 104   ;;  %vm3_vm0 = vcmask 64512   ;;  %vm9_vm1 = vcmask 1048512   ;;  %vm15_vm2 = vcmask 982912   ;;  %vm21_vm3 = vcmask 917312   ;;  %s207_s0 = inlined_call_operand.vmem [shape: f32[16,8], index: 0, kind: input, shape index: {}]   ;;  %s208_s1 = inlined_call_operand.vmem [shape: f32[1,1,128], index: 1, kind: output, shape index: {}]  }
   0x1   :  { %v101_v0 = vld [vmem:[%s207_s0 + $0xf] sm:$0x1]   ;;  %v103_v1 = vld [vmem:[%s207_s0 + $0xd] sm:$0x1]   ;;  %v102_v2 = vld [vmem:[%s207_s0 + $0xe] sm:$0x1]  }
   0x2   :  { %7 = vrot.lane.b32.xlu0 %v101_v0, %s131_s10  ;;  %19 = vrot.lane.b32.xlu1 %v103_v1, %s132_s11  ;;  %v104_v3 = vld [vmem:[%s207_s0 + $0xc] sm:$0x1]   ;;  %s133_s16 = smov 112   ;;  %s134_s17 = smov 96   ;;  %v105_v4 = vld [vmem:[%s207_s0 + $0xb] sm:$0x1]  }
   0x3   :  { %v106_v5 = vld [vmem:[%s207_s0 + $0xa] sm:$0x1]   ;;  %v2_v6 = vld [vmem:[%s207_s0] sm:$0x1]   ;;  %s135_s24 = smov 88   ;;  %s136_s25 = smov 80  }
   0x4   :  { %4 = vst.msk [vmem:[#allocation0] sm:$0x1] %vm3_vm0, %v2_v6   ;;  %v107_v7 = vld [vmem:[%s207_s0 + $0x9] sm:$0x1]   ;;  %v108_v8 = vld [vmem:[%s207_s0 + $0x8] sm:$0x1]  }
   0x5   :  { %s137_s30 = smov 72   ;;  %s138_s2 = smov 64   ;;  %v109_v9 = vld [vmem:[%s207_s0 + $0x7] sm:$0x1]   ;;  %v110_v10 = vld [vmem:[%s207_s0 + $0x6] sm:$0x1]  }
   0x6   :  { %13 = vrot.lane.b32.xlu0 %v102_v2, %s133_s16  ;;  %25 = vrot.lane.b32.xlu1 %v104_v3, %s134_s17  ;;  %s139_s7 = smov 56   ;;  %s140_s8 = smov 48   ;;  %v111_v11 = vld [vmem:[%s207_s0 + $0x5] sm:$0x1]   ;;  %v112_v12 = vld [vmem:[%s207_s0 + $0x4] sm:$0x1]  }
   0x7   :  { %s141_s13 = smov 40   ;;  %s142_s14 = smov 32   ;;  %v113_v13 = vld [vmem:[%s207_s0 + $0x3] sm:$0x1]   ;;  %v114_v14 = vld [vmem:[%s207_s0 + $0x2] sm:$0x1]  }
   0x8   :  { %s143_s19 = smov 24   ;;  %s144_s20 = smov 16   ;;  %v115_v15 = vld [vmem:[%s207_s0 + $0x1] sm:$0x1]   ;;  %vm27_vm4 = vcmask 851712   ;;  %vm33_vm5 = vcmask 786112  }
   0x9   :  { %s145_s0 = smov 8   ;;  %vm39_vm6 = vcmask 720512   ;;  %vm45_vm7 = vcmask 654912   ;;  %vm51_vm8 = vcmask 589312   ;;  %vm57_vm9 = vcmask 523712  }
   0xa   :  { %31 = vrot.lane.b32.xlu0 %v105_v4, %s135_s24  ;;  %37 = vrot.lane.b32.xlu1 %v106_v5, %s136_s25  ;;  %vm63_vm10 = vcmask 458112   ;;  %vm69_vm11 = vcmask 392512   ;;  %vm75_vm12 = vcmask 326912   ;;  %vm81_vm13 = vcmask 261312  }
   0xb   :  { %vm87_vm14 = vcmask 195712   ;;  %vm93_vm15 = vcmask 130112  }
   0xe   :  { %43 = vrot.lane.b32.xlu0 %v107_v7, %s137_s30  ;;  %49 = vrot.lane.b32.xlu1 %v108_v8, %s138_s2 }
  0x12   :  { %55 = vrot.lane.b32.xlu0 %v109_v9, %s139_s7  ;;  %61 = vrot.lane.b32.xlu1 %v110_v10, %s140_s8 }
  0x16   :  { %67 = vrot.lane.b32.xlu0 %v111_v11, %s141_s13  ;;  %73 = vrot.lane.b32.xlu1 %v112_v12, %s142_s14 }
  0x1a   :  { %79 = vrot.lane.b32.xlu0 %v113_v13, %s143_s19  ;;  %85 = vrot.lane.b32.xlu1 %v114_v14, %s144_s20 }
  0x1e   :  { %91 = vrot.lane.b32.xlu0 %v115_v15, %s145_s0 }
  0x74   :  { %v8_v16 = vpop.permute.xlu0 %7   ;;  %v20_v17 = vpop.permute.xlu1 %19  }
  0x75   :  { %10 = vst.msk [vmem:[#allocation0] sm:$0x1] %vm9_vm1, %v8_v16  }
  0x78   :  { %v14_v18 = vpop.permute.xlu0 %13   ;;  %v26_v19 = vpop.permute.xlu1 %25  }
  0x79   :  { %16 = vst.msk [vmem:[#allocation0] sm:$0x1] %vm15_vm2, %v14_v18  }
  0x7a   :  { %22 = vst.msk [vmem:[#allocation0] sm:$0x1] %vm21_vm3, %v20_v17  }
  0x7b   :  { %28 = vst.msk [vmem:[#allocation0] sm:$0x1] %vm27_vm4, %v26_v19  }
  0x7c   :  { %v32_v20 = vpop.permute.xlu0 %31   ;;  %v38_v21 = vpop.permute.xlu1 %37  }
  0x7d   :  { %34 = vst.msk [vmem:[#allocation0] sm:$0x1] %vm33_vm5, %v32_v20  }
  0x7e   :  { %40 = vst.msk [vmem:[#allocation0] sm:$0x1] %vm39_vm6, %v38_v21  }
  0x80   :  { %v44_v22 = vpop.permute.xlu0 %43   ;;  %v50_v23 = vpop.permute.xlu1 %49  }
  0x81   :  { %46 = vst.msk [vmem:[#allocation0] sm:$0x1] %vm45_vm7, %v44_v22  }
  0x82   :  { %52 = vst.msk [vmem:[#allocation0] sm:$0x1] %vm51_vm8, %v50_v23  }
  0x84   :  { %v56_v24 = vpop.permute.xlu0 %55   ;;  %v62_v25 = vpop.permute.xlu1 %61  }
  0x85   :  { %58 = vst.msk [vmem:[#allocation0] sm:$0x1] %vm57_vm9, %v56_v24  }
  0x86   :  { %64 = vst.msk [vmem:[#allocation0] sm:$0x1] %vm63_vm10, %v62_v25  }
  0x88   :  { %v68_v26 = vpop.permute.xlu0 %67   ;;  %v74_v27 = vpop.permute.xlu1 %73  }
  0x89   :  { %70 = vst.msk [vmem:[#allocation0] sm:$0x1] %vm69_vm11, %v68_v26  }
  0x8a   :  { %76 = vst.msk [vmem:[#allocation0] sm:$0x1] %vm75_vm12, %v74_v27  }
  0x8c   :  { %v80_v28 = vpop.permute.xlu0 %79   ;;  %v86_v29 = vpop.permute.xlu1 %85  }
  0x8d   :  { %82 = vst.msk [vmem:[#allocation0] sm:$0x1] %vm81_vm13, %v80_v28  }
  0x8e   :  { %88 = vst.msk [vmem:[#allocation0] sm:$0x1] %vm87_vm14, %v86_v29  }
  0x90   :  { %v92_v30 = vpop.permute.xlu0 %91  }
  0x91   :  { %94 = vst.msk [vmem:[#allocation0] sm:$0x1] %vm93_vm15, %v92_v30  }
  0x98   :  { %v98_v31 = vld [vmem:[#allocation0] sm:$0x1] }
  0x99   :  { %100 = vst [vmem:[%s208_s1] sm:$0x1] %v98_v31 }

// kernel: single_conv_forward.3
= control target key start
LH: loop header
LB: loop body
LE: loop exit
PB: predicated region body
PF: predicated region fallthrough
CT: control target
= control target key end

     0   :  { %s301_s12 = smov 0   ;;  %s318_s0 = inlined_call_operand.vmem [shape: f32[2,16,128], index: 0, kind: input, shape index: {}, may-alias: {0,3}]   ;;  %s319_s1 = inlined_call_operand.vmem [shape: f32[1,1,128], index: 1, kind: input, shape index: {}]   ;;  %s320_s2 = inlined_call_operand.vmem [shape: f32[1,1,128], index: 2, kind: input, shape index: {}]   ;;  %s321_s3 = inlined_call_operand.vmem [shape: f32[2,16,128], index: 3, kind: output, shape index: {}, may-alias: {0,3}]  }
   0x1 LB: > { %s250_s13 = sadd.s32 4294967295, %s279_s12   ;;  %p254_p0 = scmp.ge.s32.totalorder %s279_s12, 1  ;;  %s279_s12 = sphi %s301_s12, %s13_s12  }
   0x2   : > { %p137_p1 = scmp.lt.s32.totalorder %s279_s12, 3 }
   0x4   : > { %p138_p2 = pnand %p254_p0, %p137_p1 }
   0x5   : > { %p161_p3 = scmp.lt.s32.totalorder (!%p138_p2), %s250_s13, 1  ;;  %v259_v0 = vld [vmem:[%s319_s1] ss:$0 sm:$0xff] (!%p138_p2) }
   0x6   : > { %141 = sbr.rel (%p138_p2) target bundleno = 24 (0x18), region = 32  ;;  %v260_v3 = vld [vmem:[%s320_s2] ss:$0 sm:$0xff] (!%p138_p2) }
   0xd   : > { %s323_s13 = smov (!%p161_p3, %s250_s13), 1 }
   0xe   : > { %s263_s14 = sshll.u32 %s323_s13, 4 }
   0xf   : > { %s165_s19 = scalar_lea.vmem %s318_s0, %s263_s14  ;;  %s170_s24 = scalar_lea.vmem %s321_s3, %s263_s14 }
  0x10   : > { %v171_v1 = vld [vmem:[%s165_s19] sm:$0xff]  ;;  %v172_v2 = vld [vmem:[%s165_s19 + $0x8] sm:$0xff] }
  0x11   : > { %v180_v4 = vmul.f32 %v259_v0, %v171_v1  ;;  %v181_v5 = vmul.f32 %v259_v0, %v172_v2 }
  0x13   : > { %v189_v6 = vadd.f32 %v260_v3, %v180_v4  ;;  %v190_v7 = vadd.f32 %v260_v3, %v181_v5 }
  0x15   : > { %v191_v8 = vmax.f32 %v189_v6, 0.0  ;;  %v192_v9 = vmax.f32 %v190_v7, 0.0 }
  0x17   : > { %193 = vst [vmem:[%s170_s24] sm:$0xff] %v191_v8  ;;  %194 = vst [vmem:[%s170_s24 + $0x8] sm:$0xff] %v192_v9 }
  0x18 PF: > { %s13_s12 = sadd.s32 1, %s279_s12  }
  0x19   : > { %p10_p4 = scmp.ge.s32.totalorder %s13_s12, 4  }
  0x1b   :  { %12 = sbr.rel (!%p10_p4) target bundleno = 1 (0x1), region = 62 }

</bundles_post_ra>
